<compile_context>
chip_gen: v5e
topology: v5e:2x2
jax: 0.10.0
libtpu: 0.0.40
codegen_flags: <defaults>
</compile_context>

<pallas_src>
import functools

import jax
import jax.numpy as jnp
from jax.experimental import pallas as pl
from jax.experimental.pallas import tpu as pltpu


def _round_up(x, m):
    return ((x + m - 1) // m) * m


# Keep the per-call VMEM footprint comfortably inside every generation's
# physical VMEM (v7x: 64 MiB/TC, v5e/v6e: 128 MiB).  The scoped limit we
# request is capped at 64 MiB so the same setting is valid on all chips.
_VMEM_RESIDENT_BUDGET = 44 * 1024 * 1024
_VMEM_LIMIT_CAP = 64 * 1024 * 1024


def _vmem_limit(est_bytes):
    return int(min(max(est_bytes + (4 << 20), 32 << 20), _VMEM_LIMIT_CAP))


def _choose_tiles(n):
    """Adjacency tile size: up to 512, multiple of 128, >=2 dst blocks when
    possible (v7x shards the 'parallel' dst axis across its 2 TensorCores)."""
    n_pad = _round_up(n, 128)
    if n_pad <= 512:
        for tm in (256, 128):
            if n_pad % tm == 0 and n_pad // tm >= 2:
                return tm, n_pad
        return n_pad, n_pad
    for tm in (512, 384, 256, 128):
        if n_pad % tm == 0 and n_pad // tm >= 2:
            return tm, n_pad
    return 128, n_pad


# ---------------------------------------------------------------------------
# Kernel bodies
# ---------------------------------------------------------------------------
def _linear_kernel(h_ref, w_ref, out_ref):
    """HW = H @ W for one tile of rows (hoisted feature pre-transform).
    bf16 x bf16 MXU inputs, f32 accumulation."""
    out_ref[...] = jnp.dot(
        h_ref[...], w_ref[...],
        preferred_element_type=jnp.float32).astype(out_ref.dtype)


def _agg_kernel(adj_ref, x_ref, b_ref, out_ref, acc_ref, *, tk, x_resident,
                apply_act):
    """out = act(A_hat @ X + b); contraction over src tiles on grid axis 1."""
    k = pl.program_id(1)

    @pl.when(k == 0)
    def _():
        acc_ref[...] = jnp.zeros_like(acc_ref)

    if x_resident:
        # X is fully VMEM-resident; slice the current src tile in-kernel.
        x_blk = x_ref[pl.ds(pl.multiple_of(k * tk, tk), tk), :]
    else:
        x_blk = x_ref[...]
    acc_ref[...] += jnp.dot(adj_ref[...], x_blk,
                            preferred_element_type=jnp.float32)

    @pl.when(k == pl.num_programs(1) - 1)
    def _():
        out = acc_ref[...] + b_ref[...]
        if apply_act:
            out = jnp.maximum(out, 0.0)
        out_ref[...] = out.astype(out_ref.dtype)


def _agg_then_w_kernel(adj_ref, h_ref, w_ref, b_ref, out_ref, acc_ref, *, tk,
                       h_resident, apply_act):
    """out = act((A_hat @ H) @ W + b); W applied once per dst tile (finalize)."""
    k = pl.program_id(1)

    @pl.when(k == 0)
    def _():
        acc_ref[...] = jnp.zeros_like(acc_ref)

    if h_resident:
        h_blk = h_ref[pl.ds(pl.multiple_of(k * tk, tk), tk), :]
    else:
        h_blk = h_ref[...]
    acc_ref[...] += jnp.dot(adj_ref[...], h_blk,
                            preferred_element_type=jnp.float32)

    @pl.when(k == pl.num_programs(1) - 1)
    def _():
        # bf16 x bf16 MXU matmul, f32 accumulation.
        out = jnp.dot(acc_ref[...].astype(jnp.bfloat16), w_ref[...],
                      preferred_element_type=jnp.float32) + b_ref[...]
        if apply_act:
            out = jnp.maximum(out, 0.0)
        out_ref[...] = out.astype(out_ref.dtype)


# ---------------------------------------------------------------------------
# Per-layer wrapper
# ---------------------------------------------------------------------------
def gcn_layer(adj_bf16, h, w_bf16, b, *, apply_act, out_dtype, tm, tk):
    """One GraphConv layer on padded operands.

    adj_bf16: [N_pad, N_pad] bf16 normalized adjacency
    h:        [N_pad, F_in_pad] bf16 node features
    w_bf16:   [F_in_pad, F_out_pad] bf16 (zero padded)
    b:        [1, F_out_pad] f32
    """
    n_pad = adj_bf16.shape[0]
    f_in = h.shape[1]
    f_out = w_bf16.shape[1]
    n_dst = n_pad // tm
    grid = (n_dst, n_pad // tk)
    dim_sem = ("parallel", "arbitrary")
    out_bytes = jnp.dtype(out_dtype).itemsize

    if f_in <= f_out:
        # Aggregate first on the narrower width; fuse W into the finalize step.
        fixed = (tm * tk * 2 * 2            # A tile (double buffered)
                 + f_in * f_out * 2 * 2     # W (bf16, resident)
                 + f_out * 4 * 2            # bias
                 + tm * f_out * out_bytes * 2   # out tile
                 + tm * f_in * 4)           # f32 accumulator
        h_res_bytes = n_pad * f_in * 2 * 2
        h_resident = fixed + h_res_bytes <= _VMEM_RESIDENT_BUDGET
        if h_resident:
            h_spec = pl.BlockSpec((n_pad, f_in), lambda i, k: (0, 0))
            vmem_est = fixed + h_res_bytes
            h_hbm_bytes = n_pad * f_in * 2
        else:
            h_spec = pl.BlockSpec((tk, f_in), lambda i, k: (k, 0))
            vmem_est = fixed + tk * f_in * 2 * 2
            h_hbm_bytes = n_dst * n_pad * f_in * 2

        kernel = functools.partial(_agg_then_w_kernel, tk=tk,
                                   h_resident=h_resident, apply_act=apply_act)
        cost = pl.CostEstimate(
            flops=2 * n_pad * n_pad * f_in + 2 * n_pad * f_in * f_out,
            transcendentals=0,
            bytes_accessed=int(adj_bf16.size * 2 + h_hbm_bytes
                               + w_bf16.size * 2 + b.size * 4
                               + n_pad * f_out * out_bytes))
        return pl.pallas_call(
            kernel,
            out_shape=jax.ShapeDtypeStruct((n_pad, f_out), out_dtype),
            grid=grid,
            in_specs=[
                pl.BlockSpec((tm, tk), lambda i, k: (i, k)),          # A_hat
                h_spec,                                               # H
                pl.BlockSpec((f_in, f_out), lambda i, k: (0, 0)),     # W
                pl.BlockSpec((1, f_out), lambda i, k: (0, 0)),        # b
            ],
            out_specs=pl.BlockSpec((tm, f_out), lambda i, k: (i, 0)),
            scratch_shapes=[pltpu.VMEM((tm, f_in), jnp.float32)],
            compiler_params=pltpu.CompilerParams(
                dimension_semantics=dim_sem,
                vmem_limit_bytes=_vmem_limit(vmem_est)),
            cost_estimate=cost,
        )(adj_bf16, h, w_bf16, b)

    # f_out < f_in: transform once (hoisted out of the contraction loop),
    # then stream A tiles against the narrower HW.
    lin_est = (tm * f_in * 2 * 2 + f_in * f_out * 2 * 2 + tm * f_out * 2 * 2)
    hw = pl.pallas_call(
        _linear_kernel,
        out_shape=jax.ShapeDtypeStruct((n_pad, f_out), jnp.bfloat16),
        grid=(n_dst,),
        in_specs=[
            pl.BlockSpec((tm, f_in), lambda i: (i, 0)),
            pl.BlockSpec((f_in, f_out), lambda i: (0, 0)),
        ],
        out_specs=pl.BlockSpec((tm, f_out), lambda i: (i, 0)),
        compiler_params=pltpu.CompilerParams(
            dimension_semantics=("parallel",),
            vmem_limit_bytes=_vmem_limit(lin_est)),
    )(h, w_bf16)

    fixed = (tm * tk * 2 * 2 + f_out * 4 * 2 + tm * f_out * out_bytes * 2
             + tm * f_out * 4)
    hw_res_bytes = n_pad * f_out * 2 * 2
    x_resident = fixed + hw_res_bytes <= _VMEM_RESIDENT_BUDGET
    if x_resident:
        x_spec = pl.BlockSpec((n_pad, f_out), lambda i, k: (0, 0))
        vmem_est = fixed + hw_res_bytes
        hw_hbm_bytes = n_pad * f_out * 2
    else:
        x_spec = pl.BlockSpec((tk, f_out), lambda i, k: (k, 0))
        vmem_est = fixed + tk * f_out * 2 * 2
        hw_hbm_bytes = n_dst * n_pad * f_out * 2

    kernel = functools.partial(_agg_kernel, tk=tk, x_resident=x_resident,
                               apply_act=apply_act)
    cost = pl.CostEstimate(
        flops=2 * n_pad * f_in * f_out + 2 * n_pad * n_pad * f_out,
        transcendentals=0,
        bytes_accessed=int(adj_bf16.size * 2 + hw_hbm_bytes + b.size * 4
                           + n_pad * f_out * out_bytes))
    return pl.pallas_call(
        kernel,
        out_shape=jax.ShapeDtypeStruct((n_pad, f_out), out_dtype),
        grid=grid,
        in_specs=[
            pl.BlockSpec((tm, tk), lambda i, k: (i, k)),          # A_hat
            x_spec,                                               # HW
            pl.BlockSpec((1, f_out), lambda i, k: (0, 0)),        # b
        ],
        out_specs=pl.BlockSpec((tm, f_out), lambda i, k: (i, 0)),
        scratch_shapes=[pltpu.VMEM((tm, f_out), jnp.float32)],
        compiler_params=pltpu.CompilerParams(
            dimension_semantics=dim_sem,
            vmem_limit_bytes=_vmem_limit(vmem_est)),
        cost_estimate=cost,
    )(adj_bf16, hw, b)


# ---------------------------------------------------------------------------
# GCN forward (padding / tiling glue lives here, outside the kernels)
# ---------------------------------------------------------------------------
def gcn_forward(adj_hat, in_feat, params):
    n = in_feat.shape[0]
    out_dim = params[-1][0].shape[1]
    tm, n_pad = _choose_tiles(n)
    tk = tm

    # Build the padded adjacency directly in bf16 (no f32 N_pad^2 intermediate).
    adj_p = jnp.zeros((n_pad, n_pad), jnp.bfloat16)
    adj_p = adj_p.at[:n, :n].set(adj_hat.astype(jnp.bfloat16))

    f0 = in_feat.shape[1]
    f0_pad = _round_up(f0, 128)
    h = jnp.zeros((n_pad, f0_pad), jnp.bfloat16)
    h = h.at[:n, :f0].set(in_feat.astype(jnp.bfloat16))

    n_layers = len(params)
    for li, (w, b) in enumerate(params):
        f_in, f_out = w.shape
        f_in_pad = _round_up(f_in, 128)
        f_out_pad = _round_up(f_out, 128)
        # NOTE: if a large-f config ever becomes compute-bound on v6e/v7x,
        # pad feature dims to 256 instead (256-wide MXU); 128 is fine while
        # the kernel is HBM-bound on streaming A_hat.
        w_p = jnp.zeros((f_in_pad, f_out_pad), jnp.bfloat16)
        w_p = w_p.at[:f_in, :f_out].set(w.astype(jnp.bfloat16))
        b_p = jnp.zeros((1, f_out_pad), jnp.float32).at[0, :f_out].set(b)

        is_last = li == n_layers - 1
        out_dtype = jnp.float32 if is_last else jnp.bfloat16
        h = gcn_layer(adj_p, h, w_p, b_p, apply_act=not is_last,
                      out_dtype=out_dtype, tm=tm, tk=tk)

    return h[:n, :out_dim]


gcn_forward_jit = jax.jit(gcn_forward)


# ---------------------------------------------------------------------------
# Parameter / graph construction + plain-JAX reference (glue, not kernels)
# ---------------------------------------------------------------------------
def make_gcn_params(key, in_feats, h_feats, out_dim, n_layers):
    """Xavier-uniform weights, zero biases (as in DGL GraphConv)."""
    dims = [in_feats] + [h_feats] * n_layers + [out_dim]
    params = []
    for i in range(len(dims) - 1):
        key, sub = jax.random.split(key)
        fan_in, fan_out = dims[i], dims[i + 1]
        limit = jnp.sqrt(6.0 / (fan_in + fan_out))
        w = jax.random.uniform(sub, (fan_in, fan_out), jnp.float32,
                               minval=-limit, maxval=limit)
        b = jnp.zeros((fan_out,), jnp.float32)
        params.append((w, b))
    return params


def normalized_adjacency(adj):
    """A_hat = D_in^{-1/2} A D_out^{-1/2}, degrees clamped to >= 1 (DGL)."""
    out_deg = jnp.clip(adj.sum(axis=0), 1.0)   # out-degree of src nodes
    in_deg = jnp.clip(adj.sum(axis=1), 1.0)    # in-degree of dst nodes
    return adj * (in_deg[:, None] ** -0.5) * (out_deg[None, :] ** -0.5)


def gcn_reference(adj_hat, in_feat, params):
    h = in_feat
    n_layers = len(params)
    for li, (w, b) in enumerate(params):
        h = adj_hat @ (h @ w) + b
        if li != n_layers - 1:
            h = jnp.maximum(h, 0.0)
    return h


if __name__ == "__main__":
    key = jax.random.PRNGKey(0)

    # Small synthetic graph + features.  IN_FEATS pads to 256 > hidden's 128,
    # so layer 0 exercises the transform-first path and the rest the fused
    # aggregate-then-W path.
    N = 16           # nodes
    IN_FEATS = 192
    H_FEATS = 32
    OUT_DIM = 16
    N_LAYERS = 2     # -> 3 GraphConv layers total (matches the module)

    key, k_adj, k_feat, k_param = jax.random.split(key, 4)
    # Random directed adjacency with self loops; A[dst, src] = 1 iff edge src->dst.
    adj = (jax.random.uniform(k_adj, (N, N)) < 0.25).astype(jnp.float32)
    adj = jnp.maximum(adj, jnp.eye(N, dtype=jnp.float32))
    adj_hat = normalized_adjacency(adj)

    in_feat = jax.random.normal(k_feat, (N, IN_FEATS), jnp.float32)
    params = make_gcn_params(k_param, IN_FEATS, H_FEATS, OUT_DIM, N_LAYERS)

    out = gcn_forward_jit(adj_hat, in_feat, params)
    out = jax.block_until_ready(out)
    assert out.shape == (N, OUT_DIM)
    assert bool(jnp.isfinite(out).all())

    # Loose check vs f32 reference (bf16 inputs with f32 accumulation).
    ref = gcn_reference(adj_hat, in_feat, params)
    rel_err = float(jnp.max(jnp.abs(out - ref)) / (jnp.max(jnp.abs(ref)) + 1e-6))
    assert rel_err < 0.1, f"relative error too large: {rel_err}"
    print("KERNEL_OK")
</pallas_src>

<mosaic_0001>
module attributes {stable_mosaic.version = 11 : i64} {
  func.func @_linear_kernel(%arg0: i32, %arg1: memref<128x256xbf16, #tpu.memory_space<vmem>>, %arg2: memref<256x128xbf16, #tpu.memory_space<vmem>>, %arg3: memref<128x128xbf16, #tpu.memory_space<vmem>>) attributes {dimension_semantics = [#tpu.dimension_semantics<parallel>], iteration_bounds = array<i64: 1>, scalar_prefetch = 0 : i64, scratch_operands = 0 : i64, tpu.core_type = #tpu.core_type<tc>, window_params = [{transform_indices = @transform_0, window_bounds = array<i64: 128, 256>}, {pipeline_mode = #tpu.pipeline_mode<synchronous>, transform_indices = @transform_1, window_bounds = array<i64: 256, 128>}, {transform_indices = @transform_2, window_bounds = array<i64: 128, 128>}]} {
    %c0 = arith.constant 0 : index
    %c0_0 = arith.constant 0 : index
    %0 = vector.load %arg1[%c0, %c0_0] : memref<128x256xbf16, #tpu.memory_space<vmem>>, vector<128x256xbf16>
    %c0_1 = arith.constant 0 : index
    %c0_2 = arith.constant 0 : index
    %1 = vector.load %arg2[%c0_1, %c0_2] : memref<256x128xbf16, #tpu.memory_space<vmem>>, vector<256x128xbf16>
    %cst = arith.constant dense<0.000000e+00> : vector<128x128xf32>
    %2 = tpu.matmul %0, %1, %cst {dimension_numbers = #tpu.dot_dimension_numbers<[1], [0], [0], [1], [0, 0, 1, 1], [], []>} : vector<128x256xbf16>, vector<256x128xbf16>, vector<128x128xf32> -> vector<128x128xf32>
    %3 = arith.truncf %2 : vector<128x128xf32> to vector<128x128xbf16>
    %c0_3 = arith.constant 0 : index
    %c0_4 = arith.constant 0 : index
    %4 = vector.load %arg3[%c0_3, %c0_4] : memref<128x128xbf16, #tpu.memory_space<vmem>>, vector<128x128xbf16>
    tpu.vector_store %arg3[%c0_3, %c0_4], %3 {strides = array<i32>} : memref<128x128xbf16, #tpu.memory_space<vmem>>, vector<128x128xbf16>,
    return
  }
  func.func @transform_0(%arg0: i32) -> (i32, i32) {
    %c0_i32 = arith.constant 0 : i32
    %c0_i32_0 = arith.constant 0 : i32
    return %arg0, %c0_i32 : i32, i32
  }
  func.func @transform_1(%arg0: i32) -> (i32, i32) {
    %c0_i32 = arith.constant 0 : i32
    %c0_i32_0 = arith.constant 0 : i32
    %c0_i32_1 = arith.constant 0 : i32
    return %c0_i32, %c0_i32_0 : i32, i32
  }
  func.func @transform_2(%arg0: i32) -> (i32, i32) {
    %c0_i32 = arith.constant 0 : i32
    %c0_i32_0 = arith.constant 0 : i32
    return %arg0, %c0_i32 : i32, i32
  }
}

module attributes {stable_mosaic.version = 11 : i64} {
  func.func @_agg_kernel(%arg0: i32, %arg1: i32, %arg2: memref<128x128xbf16, #tpu.memory_space<vmem>>, %arg3: memref<128x128xbf16, #tpu.memory_space<vmem>>, %arg4: memref<1x128xf32, #tpu.memory_space<vmem>>, %arg5: memref<128x128xbf16, #tpu.memory_space<vmem>>, %arg6: memref<128x128xf32, #tpu.memory_space<vmem>>) attributes {dimension_semantics = [#tpu.dimension_semantics<parallel>, #tpu.dimension_semantics<arbitrary>], iteration_bounds = array<i64: 1, 1>, scalar_prefetch = 0 : i64, scratch_operands = 1 : i64, tpu.core_type = #tpu.core_type<tc>, window_params = [{transform_indices = @transform_0, window_bounds = array<i64: 128, 128>}, {pipeline_mode = #tpu.pipeline_mode<synchronous>, transform_indices = @transform_1, window_bounds = array<i64: 128, 128>}, {pipeline_mode = #tpu.pipeline_mode<synchronous>, transform_indices = @transform_2, window_bounds = array<i64: 1, 128>}, {transform_indices = @transform_3, window_bounds = array<i64: 128, 128>}]} {
    %c0_i32 = arith.constant 0 : i32
    %0 = arith.cmpi eq, %arg1, %c0_i32 : i32
    %1 = arith.extui %0 : i1 to i32
    %c0_i32_0 = arith.constant 0 : i32
    %2 = arith.cmpi ne, %1, %c0_i32_0 : i32
    scf.if %2 {
      %cst_9 = arith.constant 0.000000e+00 : f32
      %15 = vector.broadcast %cst_9 : f32 to vector<128x128xf32>
      %c0_10 = arith.constant 0 : index
      %c0_11 = arith.constant 0 : index
      %16 = vector.load %arg6[%c0_10, %c0_11] : memref<128x128xf32, #tpu.memory_space<vmem>>, vector<128x128xf32>
      tpu.vector_store %arg6[%c0_10, %c0_11], %15 {strides = array<i32>} : memref<128x128xf32, #tpu.memory_space<vmem>>, vector<128x128xf32>,
    } else {
    }
    %c128_i32 = arith.constant 128 : i32
    %3 = arith.muli %arg1, %c128_i32 : i32
    %4 = tpu.assume_multiple %3, 128 : i32
    %5 = arith.index_cast %4 : i32 to index
    %c0 = arith.constant 0 : index
    %6 = vector.load %arg3[%5, %c0] : memref<128x128xbf16, #tpu.memory_space<vmem>>, vector<128x128xbf16>
    %c0_1 = arith.constant 0 : index
    %c0_2 = arith.constant 0 : index
    %7 = vector.load %arg6[%c0_1, %c0_2] : memref<128x128xf32, #tpu.memory_space<vmem>>, vector<128x128xf32>
    %c0_3 = arith.constant 0 : index
    %c0_4 = arith.constant 0 : index
    %8 = vector.load %arg2[%c0_3, %c0_4] : memref<128x128xbf16, #tpu.memory_space<vmem>>, vector<128x128xbf16>
    %cst = arith.constant dense<0.000000e+00> : vector<128x128xf32>
    %9 = tpu.matmul %8, %6, %cst {dimension_numbers = #tpu.dot_dimension_numbers<[1], [0], [0], [1], [0, 0, 1, 1], [], []>} : vector<128x128xbf16>, vector<128x128xbf16>, vector<128x128xf32> -> vector<128x128xf32>
    %10 = arith.addf %7, %9 : vector<128x128xf32>
    %c0_5 = arith.constant 0 : index
    %c0_6 = arith.constant 0 : index
    %11 = vector.load %arg6[%c0_5, %c0_6] : memref<128x128xf32, #tpu.memory_space<vmem>>, vector<128x128xf32>
    tpu.vector_store %arg6[%c0_5, %c0_6], %10 {strides = array<i32>} : memref<128x128xf32, #tpu.memory_space<vmem>>, vector<128x128xf32>,
    %c0_i32_7 = arith.constant 0 : i32
    %12 = arith.cmpi eq, %arg1, %c0_i32_7 : i32
    %13 = arith.extui %12 : i1 to i32
    %c0_i32_8 = arith.constant 0 : i32
    %14 = arith.cmpi ne, %13, %c0_i32_8 : i32
    scf.if %14 {
      %c0_9 = arith.constant 0 : index
      %c0_10 = arith.constant 0 : index
      %15 = vector.load %arg6[%c0_9, %c0_10] : memref<128x128xf32, #tpu.memory_space<vmem>>, vector<128x128xf32>
      %c0_11 = arith.constant 0 : index
      %c0_12 = arith.constant 0 : index
      %16 = vector.load %arg4[%c0_11, %c0_12] : memref<1x128xf32, #tpu.memory_space<vmem>>, vector<1x128xf32>
      %17 = vector.broadcast %16 : vector<1x128xf32> to vector<128x128xf32>
      %18 = arith.addf %15, %17 : vector<128x128xf32>
      %cst_13 = arith.constant 0.000000e+00 : f32
      %19 = vector.broadcast %cst_13 : f32 to vector<128x128xf32>
      %20 = arith.maximumf %18, %19 : vector<128x128xf32>
      %21 = arith.truncf %20 : vector<128x128xf32> to vector<128x128xbf16>
      %c0_14 = arith.constant 0 : index
      %c0_15 = arith.constant 0 : index
      %22 = vector.load %arg5[%c0_14, %c0_15] : memref<128x128xbf16, #tpu.memory_space<vmem>>, vector<128x128xbf16>
      tpu.vector_store %arg5[%c0_14, %c0_15], %21 {strides = array<i32>} : memref<128x128xbf16, #tpu.memory_space<vmem>>, vector<128x128xbf16>,
    } else {
    }
    return
  }
  func.func @transform_0(%arg0: i32, %arg1: i32) -> (i32, i32) {
    %c0_i32 = arith.constant 0 : i32
    return %arg0, %arg1 : i32, i32
  }
  func.func @transform_1(%arg0: i32, %arg1: i32) -> (i32, i32) {
    %c0_i32 = arith.constant 0 : i32
    %c0_i32_0 = arith.constant 0 : i32
    %c0_i32_1 = arith.constant 0 : i32
    return %c0_i32, %c0_i32_0 : i32, i32
  }
  func.func @transform_2(%arg0: i32, %arg1: i32) -> (i32, i32) {
    %c0_i32 = arith.constant 0 : i32
    %c0_i32_0 = arith.constant 0 : i32
    %c0_i32_1 = arith.constant 0 : i32
    return %c0_i32, %c0_i32_0 : i32, i32
  }
  func.func @transform_3(%arg0: i32, %arg1: i32) -> (i32, i32) {
    %c0_i32 = arith.constant 0 : i32
    %c0_i32_0 = arith.constant 0 : i32
    return %arg0, %c0_i32 : i32, i32
  }
}

module attributes {stable_mosaic.version = 11 : i64} {
  func.func @_agg_then_w_kernel(%arg0: i32, %arg1: i32, %arg2: memref<128x128xbf16, #tpu.memory_space<vmem>>, %arg3: memref<128x128xbf16, #tpu.memory_space<vmem>>, %arg4: memref<128x128xbf16, #tpu.memory_space<vmem>>, %arg5: memref<1x128xf32, #tpu.memory_space<vmem>>, %arg6: memref<128x128xbf16, #tpu.memory_space<vmem>>, %arg7: memref<128x128xf32, #tpu.memory_space<vmem>>) attributes {dimension_semantics = [#tpu.dimension_semantics<parallel>, #tpu.dimension_semantics<arbitrary>], iteration_bounds = array<i64: 1, 1>, scalar_prefetch = 0 : i64, scratch_operands = 1 : i64, tpu.core_type = #tpu.core_type<tc>, window_params = [{transform_indices = @transform_0, window_bounds = array<i64: 128, 128>}, {pipeline_mode = #tpu.pipeline_mode<synchronous>, transform_indices = @transform_1, window_bounds = array<i64: 128, 128>}, {pipeline_mode = #tpu.pipeline_mode<synchronous>, transform_indices = @transform_2, window_bounds = array<i64: 128, 128>}, {pipeline_mode = #tpu.pipeline_mode<synchronous>, transform_indices = @transform_3, window_bounds = array<i64: 1, 128>}, {transform_indices = @transform_4, window_bounds = array<i64: 128, 128>}]} {
    %c0_i32 = arith.constant 0 : i32
    %0 = arith.cmpi eq, %arg1, %c0_i32 : i32
    %1 = arith.extui %0 : i1 to i32
    %c0_i32_0 = arith.constant 0 : i32
    %2 = arith.cmpi ne, %1, %c0_i32_0 : i32
    scf.if %2 {
      %cst_9 = arith.constant 0.000000e+00 : f32
      %15 = vector.broadcast %cst_9 : f32 to vector<128x128xf32>
      %c0_10 = arith.constant 0 : index
      %c0_11 = arith.constant 0 : index
      %16 = vector.load %arg7[%c0_10, %c0_11] : memref<128x128xf32, #tpu.memory_space<vmem>>, vector<128x128xf32>
      tpu.vector_store %arg7[%c0_10, %c0_11], %15 {strides = array<i32>} : memref<128x128xf32, #tpu.memory_space<vmem>>, vector<128x128xf32>,
    } else {
    }
    %c128_i32 = arith.constant 128 : i32
    %3 = arith.muli %arg1, %c128_i32 : i32
    %4 = tpu.assume_multiple %3, 128 : i32
    %5 = arith.index_cast %4 : i32 to index
    %c0 = arith.constant 0 : index
    %6 = vector.load %arg3[%5, %c0] : memref<128x128xbf16, #tpu.memory_space<vmem>>, vector<128x128xbf16>
    %c0_1 = arith.constant 0 : index
    %c0_2 = arith.constant 0 : index
    %7 = vector.load %arg7[%c0_1, %c0_2] : memref<128x128xf32, #tpu.memory_space<vmem>>, vector<128x128xf32>
    %c0_3 = arith.constant 0 : index
    %c0_4 = arith.constant 0 : index
    %8 = vector.load %arg2[%c0_3, %c0_4] : memref<128x128xbf16, #tpu.memory_space<vmem>>, vector<128x128xbf16>
    %cst = arith.constant dense<0.000000e+00> : vector<128x128xf32>
    %9 = tpu.matmul %8, %6, %cst {dimension_numbers = #tpu.dot_dimension_numbers<[1], [0], [0], [1], [0, 0, 1, 1], [], []>} : vector<128x128xbf16>, vector<128x128xbf16>, vector<128x128xf32> -> vector<128x128xf32>
    %10 = arith.addf %7, %9 : vector<128x128xf32>
    %c0_5 = arith.constant 0 : index
    %c0_6 = arith.constant 0 : index
    %11 = vector.load %arg7[%c0_5, %c0_6] : memref<128x128xf32, #tpu.memory_space<vmem>>, vector<128x128xf32>
    tpu.vector_store %arg7[%c0_5, %c0_6], %10 {strides = array<i32>} : memref<128x128xf32, #tpu.memory_space<vmem>>, vector<128x128xf32>,
    %c0_i32_7 = arith.constant 0 : i32
    %12 = arith.cmpi eq, %arg1, %c0_i32_7 : i32
    %13 = arith.extui %12 : i1 to i32
    %c0_i32_8 = arith.constant 0 : i32
    %14 = arith.cmpi ne, %13, %c0_i32_8 : i32
    scf.if %14 {
      %c0_9 = arith.constant 0 : index
      %c0_10 = arith.constant 0 : index
      %15 = vector.load %arg7[%c0_9, %c0_10] : memref<128x128xf32, #tpu.memory_space<vmem>>, vector<128x128xf32>
      %16 = arith.truncf %15 : vector<128x128xf32> to vector<128x128xbf16>
      %c0_11 = arith.constant 0 : index
      %c0_12 = arith.constant 0 : index
      %17 = vector.load %arg4[%c0_11, %c0_12] : memref<128x128xbf16, #tpu.memory_space<vmem>>, vector<128x128xbf16>
      %cst_13 = arith.constant dense<0.000000e+00> : vector<128x128xf32>
      %18 = tpu.matmul %16, %17, %cst_13 {dimension_numbers = #tpu.dot_dimension_numbers<[1], [0], [0], [1], [0, 0, 1, 1], [], []>} : vector<128x128xbf16>, vector<128x128xbf16>, vector<128x128xf32> -> vector<128x128xf32>
      %c0_14 = arith.constant 0 : index
      %c0_15 = arith.constant 0 : index
      %19 = vector.load %arg5[%c0_14, %c0_15] : memref<1x128xf32, #tpu.memory_space<vmem>>, vector<1x128xf32>
      %20 = vector.broadcast %19 : vector<1x128xf32> to vector<128x128xf32>
      %21 = arith.addf %18, %20 : vector<128x128xf32>
      %cst_16 = arith.constant 0.000000e+00 : f32
      %22 = vector.broadcast %cst_16 : f32 to vector<128x128xf32>
      %23 = arith.maximumf %21, %22 : vector<128x128xf32>
      %24 = arith.truncf %23 : vector<128x128xf32> to vector<128x128xbf16>
      %c0_17 = arith.constant 0 : index
      %c0_18 = arith.constant 0 : index
      %25 = vector.load %arg6[%c0_17, %c0_18] : memref<128x128xbf16, #tpu.memory_space<vmem>>, vector<128x128xbf16>
      tpu.vector_store %arg6[%c0_17, %c0_18], %24 {strides = array<i32>} : memref<128x128xbf16, #tpu.memory_space<vmem>>, vector<128x128xbf16>,
    } else {
    }
    return
  }
  func.func @transform_0(%arg0: i32, %arg1: i32) -> (i32, i32) {
    %c0_i32 = arith.constant 0 : i32
    return %arg0, %arg1 : i32, i32
  }
  func.func @transform_1(%arg0: i32, %arg1: i32) -> (i32, i32) {
    %c0_i32 = arith.constant 0 : i32
    %c0_i32_0 = arith.constant 0 : i32
    %c0_i32_1 = arith.constant 0 : i32
    return %c0_i32, %c0_i32_0 : i32, i32
  }
  func.func @transform_2(%arg0: i32, %arg1: i32) -> (i32, i32) {
    %c0_i32 = arith.constant 0 : i32
    %c0_i32_0 = arith.constant 0 : i32
    %c0_i32_1 = arith.constant 0 : i32
    return %c0_i32, %c0_i32_0 : i32, i32
  }
  func.func @transform_3(%arg0: i32, %arg1: i32) -> (i32, i32) {
    %c0_i32 = arith.constant 0 : i32
    %c0_i32_0 = arith.constant 0 : i32
    %c0_i32_1 = arith.constant 0 : i32
    return %c0_i32, %c0_i32_0 : i32, i32
  }
  func.func @transform_4(%arg0: i32, %arg1: i32) -> (i32, i32) {
    %c0_i32 = arith.constant 0 : i32
    %c0_i32_0 = arith.constant 0 : i32
    return %arg0, %c0_i32 : i32, i32
  }
}

module attributes {stable_mosaic.version = 11 : i64} {
  func.func @_agg_then_w_kernel(%arg0: i32, %arg1: i32, %arg2: memref<128x128xbf16, #tpu.memory_space<vmem>>, %arg3: memref<128x128xbf16, #tpu.memory_space<vmem>>, %arg4: memref<128x128xbf16, #tpu.memory_space<vmem>>, %arg5: memref<1x128xf32, #tpu.memory_space<vmem>>, %arg6: memref<128x128xf32, #tpu.memory_space<vmem>>, %arg7: memref<128x128xf32, #tpu.memory_space<vmem>>) attributes {dimension_semantics = [#tpu.dimension_semantics<parallel>, #tpu.dimension_semantics<arbitrary>], iteration_bounds = array<i64: 1, 1>, scalar_prefetch = 0 : i64, scratch_operands = 1 : i64, tpu.core_type = #tpu.core_type<tc>, window_params = [{transform_indices = @transform_0, window_bounds = array<i64: 128, 128>}, {pipeline_mode = #tpu.pipeline_mode<synchronous>, transform_indices = @transform_1, window_bounds = array<i64: 128, 128>}, {pipeline_mode = #tpu.pipeline_mode<synchronous>, transform_indices = @transform_2, window_bounds = array<i64: 128, 128>}, {pipeline_mode = #tpu.pipeline_mode<synchronous>, transform_indices = @transform_3, window_bounds = array<i64: 1, 128>}, {transform_indices = @transform_4, window_bounds = array<i64: 128, 128>}]} {
    %c0_i32 = arith.constant 0 : i32
    %0 = arith.cmpi eq, %arg1, %c0_i32 : i32
    %1 = arith.extui %0 : i1 to i32
    %c0_i32_0 = arith.constant 0 : i32
    %2 = arith.cmpi ne, %1, %c0_i32_0 : i32
    scf.if %2 {
      %cst_9 = arith.constant 0.000000e+00 : f32
      %15 = vector.broadcast %cst_9 : f32 to vector<128x128xf32>
      %c0_10 = arith.constant 0 : index
      %c0_11 = arith.constant 0 : index
      %16 = vector.load %arg7[%c0_10, %c0_11] : memref<128x128xf32, #tpu.memory_space<vmem>>, vector<128x128xf32>
      tpu.vector_store %arg7[%c0_10, %c0_11], %15 {strides = array<i32>} : memref<128x128xf32, #tpu.memory_space<vmem>>, vector<128x128xf32>,
    } else {
    }
    %c128_i32 = arith.constant 128 : i32
    %3 = arith.muli %arg1, %c128_i32 : i32
    %4 = tpu.assume_multiple %3, 128 : i32
    %5 = arith.index_cast %4 : i32 to index
    %c0 = arith.constant 0 : index
    %6 = vector.load %arg3[%5, %c0] : memref<128x128xbf16, #tpu.memory_space<vmem>>, vector<128x128xbf16>
    %c0_1 = arith.constant 0 : index
    %c0_2 = arith.constant 0 : index
    %7 = vector.load %arg7[%c0_1, %c0_2] : memref<128x128xf32, #tpu.memory_space<vmem>>, vector<128x128xf32>
    %c0_3 = arith.constant 0 : index
    %c0_4 = arith.constant 0 : index
    %8 = vector.load %arg2[%c0_3, %c0_4] : memref<128x128xbf16, #tpu.memory_space<vmem>>, vector<128x128xbf16>
    %cst = arith.constant dense<0.000000e+00> : vector<128x128xf32>
    %9 = tpu.matmul %8, %6, %cst {dimension_numbers = #tpu.dot_dimension_numbers<[1], [0], [0], [1], [0, 0, 1, 1], [], []>} : vector<128x128xbf16>, vector<128x128xbf16>, vector<128x128xf32> -> vector<128x128xf32>
    %10 = arith.addf %7, %9 : vector<128x128xf32>
    %c0_5 = arith.constant 0 : index
    %c0_6 = arith.constant 0 : index
    %11 = vector.load %arg7[%c0_5, %c0_6] : memref<128x128xf32, #tpu.memory_space<vmem>>, vector<128x128xf32>
    tpu.vector_store %arg7[%c0_5, %c0_6], %10 {strides = array<i32>} : memref<128x128xf32, #tpu.memory_space<vmem>>, vector<128x128xf32>,
    %c0_i32_7 = arith.constant 0 : i32
    %12 = arith.cmpi eq, %arg1, %c0_i32_7 : i32
    %13 = arith.extui %12 : i1 to i32
    %c0_i32_8 = arith.constant 0 : i32
    %14 = arith.cmpi ne, %13, %c0_i32_8 : i32
    scf.if %14 {
      %c0_9 = arith.constant 0 : index
      %c0_10 = arith.constant 0 : index
      %15 = vector.load %arg7[%c0_9, %c0_10] : memref<128x128xf32, #tpu.memory_space<vmem>>, vector<128x128xf32>
      %16 = arith.truncf %15 : vector<128x128xf32> to vector<128x128xbf16>
      %c0_11 = arith.constant 0 : index
      %c0_12 = arith.constant 0 : index
      %17 = vector.load %arg4[%c0_11, %c0_12] : memref<128x128xbf16, #tpu.memory_space<vmem>>, vector<128x128xbf16>
      %cst_13 = arith.constant dense<0.000000e+00> : vector<128x128xf32>
      %18 = tpu.matmul %16, %17, %cst_13 {dimension_numbers = #tpu.dot_dimension_numbers<[1], [0], [0], [1], [0, 0, 1, 1], [], []>} : vector<128x128xbf16>, vector<128x128xbf16>, vector<128x128xf32> -> vector<128x128xf32>
      %c0_14 = arith.constant 0 : index
      %c0_15 = arith.constant 0 : index
      %19 = vector.load %arg5[%c0_14, %c0_15] : memref<1x128xf32, #tpu.memory_space<vmem>>, vector<1x128xf32>
      %20 = vector.broadcast %19 : vector<1x128xf32> to vector<128x128xf32>
      %21 = arith.addf %18, %20 : vector<128x128xf32>
      %c0_16 = arith.constant 0 : index
      %c0_17 = arith.constant 0 : index
      %22 = vector.load %arg6[%c0_16, %c0_17] : memref<128x128xf32, #tpu.memory_space<vmem>>, vector<128x128xf32>
      tpu.vector_store %arg6[%c0_16, %c0_17], %21 {strides = array<i32>} : memref<128x128xf32, #tpu.memory_space<vmem>>, vector<128x128xf32>,
    } else {
    }
    return
  }
  func.func @transform_0(%arg0: i32, %arg1: i32) -> (i32, i32) {
    %c0_i32 = arith.constant 0 : i32
    return %arg0, %arg1 : i32, i32
  }
  func.func @transform_1(%arg0: i32, %arg1: i32) -> (i32, i32) {
    %c0_i32 = arith.constant 0 : i32
    %c0_i32_0 = arith.constant 0 : i32
    %c0_i32_1 = arith.constant 0 : i32
    return %c0_i32, %c0_i32_0 : i32, i32
  }
  func.func @transform_2(%arg0: i32, %arg1: i32) -> (i32, i32) {
    %c0_i32 = arith.constant 0 : i32
    %c0_i32_0 = arith.constant 0 : i32
    %c0_i32_1 = arith.constant 0 : i32
    return %c0_i32, %c0_i32_0 : i32, i32
  }
  func.func @transform_3(%arg0: i32, %arg1: i32) -> (i32, i32) {
    %c0_i32 = arith.constant 0 : i32
    %c0_i32_0 = arith.constant 0 : i32
    %c0_i32_1 = arith.constant 0 : i32
    return %c0_i32, %c0_i32_0 : i32, i32
  }
  func.func @transform_4(%arg0: i32, %arg1: i32) -> (i32, i32) {
    %c0_i32 = arith.constant 0 : i32
    %c0_i32_0 = arith.constant 0 : i32
    return %arg0, %c0_i32 : i32, i32
  }
}

</mosaic_0001>

<bundles_post_ra>
// kernel: gcn_forward.4
= control target key start
LH: loop header
LB: loop body
LE: loop exit
PB: predicated region body
PF: predicated region fallthrough
CT: control target
= control target key end

     0   :  { %s775_s1 = inlined_call_operand.vmem [shape: bf16[256,128], index: 1, kind: input, shape index: {}]   ;;  %s776_s0 = inlined_call_operand.vmem [shape: bf16[128,256], index: 0, kind: input, shape index: {}]   ;;  %s777_s2 = inlined_call_operand.vmem [shape: bf16[128,128], index: 2, kind: output, shape index: {}]  }
   0x1   :  { %v520_v0 = vld [vmem:[%s775_s1 + $0x38] sm:$0xff]  ;;  %v519_v2 = vld [vmem:[%s775_s1 + $0x30] sm:$0xff]  ;;  %v518_v4 = vld [vmem:[%s775_s1 + $0x28] sm:$0xff] }
   0x2   :  { %v528_v1 = vld [vmem:[%s775_s1 + $0x78] sm:$0xff]  ;;  %235 = vmatpush.bf16.msra.mxu0 %v520_v0  ;;  %576 = vmatpush.bf16.msra.mxu2 %v520_v0  ;;  %v527_v3 = vld [vmem:[%s775_s1 + $0x70] sm:$0xff]  ;;  %v526_v5 = vld [vmem:[%s775_s1 + $0x68] sm:$0xff] }
   0x3   :  { %284 = vmatpush.bf16.msra.mxu1 %v528_v1  ;;  %584 = vmatpush.bf16.msra.mxu3 %v528_v1  ;;  %v517_v6 = vld [vmem:[%s775_s1 + $0x20] sm:$0xff]  ;;  %v516_v8 = vld [vmem:[%s775_s1 + $0x18] sm:$0xff]  ;;  %v515_v10 = vld [vmem:[%s775_s1 + $0x10] sm:$0xff] }
   0x4   :  { %v525_v7 = vld [vmem:[%s775_s1 + $0x60] sm:$0xff]  ;;  %v524_v9 = vld [vmem:[%s775_s1 + $0x58] sm:$0xff]  ;;  %v523_v11 = vld [vmem:[%s775_s1 + $0x50] sm:$0xff] }
   0x5   :  { %v514_v12 = vld [vmem:[%s775_s1 + $0x8] sm:$0xff]  ;;  %v513_v14 = vld [vmem:[%s775_s1] sm:$0xff]  ;;  %v379_v28 = vld [vmem:[%s776_s0 + $0x10] sm:$0xf] }
   0x6   :  { %236 = vmatpush.bf16.msra.mxu0 %v519_v2  ;;  %577 = vmatpush.bf16.msra.mxu2 %v519_v2  ;;  %v522_v13 = vld [vmem:[%s775_s1 + $0x48] sm:$0xff]  ;;  %v521_v15 = vld [vmem:[%s775_s1 + $0x40] sm:$0xff]  ;;  %v500_v29 = vld [vmem:[%s776_s0 + $0x14] sm:$0xf0] }
   0x7   :  { %285 = vmatpush.bf16.msra.mxu1 %v527_v3  ;;  %585 = vmatpush.bf16.msra.mxu3 %v527_v3  ;;  %v371_v16 = vld [vmem:[%s776_s0] sm:$0xf]  ;;  %v498_v17 = vld [vmem:[%s776_s0 + $0x4] sm:$0xf0]  ;;  %v497_v20 = vld [vmem:[%s776_s0 + $0x4] sm:$0xf]  ;;  %v380_v36 = vor.u32 %v500_v29, %v379_v28 }
   0x8   :  { %v403_v18 = vld [vmem:[%s776_s0 + $0x40] sm:$0xf]  ;;  %v506_v19 = vld [vmem:[%s776_s0 + $0x44] sm:$0xf0]  ;;  %v373_v21 = vld [vmem:[%s776_s0 + $0x8] sm:$0xf0]  ;;  %v372_v24 = vor.u32 %v498_v17, %v371_v16 }
   0x9   :  { %v505_v22 = vld [vmem:[%s776_s0 + $0x44] sm:$0xf]  ;;  %v405_v23 = vld [vmem:[%s776_s0 + $0x48] sm:$0xf0]  ;;  %v404_v25 = vor.u32 %v506_v19, %v403_v18  ;;  %v376_v26 = vor.u32 %v497_v20, %v373_v21  ;;  %v411_v30 = vld [vmem:[%s776_s0 + $0x50] sm:$0xf] }
   0xa   :  { %237 = vmatpush.bf16.msra.mxu0 %v518_v4  ;;  %578 = vmatpush.bf16.msra.mxu2 %v518_v4  ;;  %v408_v27 = vor.u32 %v505_v22, %v405_v23  ;;  %v508_v31 = vld [vmem:[%s776_s0 + $0x54] sm:$0xf0]  ;;  %v499_v32 = vld [vmem:[%s776_s0 + $0x14] sm:$0xf]  ;;  %v381_v33 = vld [vmem:[%s776_s0 + $0x18] sm:$0xf0] }
   0xb   :  { %286 = vmatpush.bf16.msra.mxu1 %v526_v5  ;;  %586 = vmatpush.bf16.msra.mxu3 %v526_v5  ;;  %v507_v34 = vld [vmem:[%s776_s0 + $0x54] sm:$0xf]  ;;  %v413_v35 = vld [vmem:[%s776_s0 + $0x58] sm:$0xf0]  ;;  %v412_v37 = vor.u32 %v508_v31, %v411_v30  ;;  %v384_v38 = vor.u32 %v499_v32, %v381_v33  ;;  %v387_v40 = vld [vmem:[%s776_s0 + $0x20] sm:$0xf] }
   0xc   :  { %v416_v39 = vor.u32 %v507_v34, %v413_v35  ;;  %v502_v41 = vld [vmem:[%s776_s0 + $0x24] sm:$0xf0]  ;;  %v419_v42 = vld [vmem:[%s776_s0 + $0x60] sm:$0xf]  ;;  %v501_v44 = vld [vmem:[%s776_s0 + $0x24] sm:$0xf] }
   0xd   :  { %v510_v43 = vld [vmem:[%s776_s0 + $0x64] sm:$0xf0]  ;;  %v389_v45 = vld [vmem:[%s776_s0 + $0x28] sm:$0xf0]  ;;  %v509_v46 = vld [vmem:[%s776_s0 + $0x64] sm:$0xf]  ;;  %v388_v48 = vor.u32 %v502_v41, %v387_v40 }
   0xe   :  { %238 = vmatpush.bf16.msra.mxu0 %v517_v6  ;;  %579 = vmatpush.bf16.msra.mxu2 %v517_v6  ;;  %v421_v47 = vld [vmem:[%s776_s0 + $0x68] sm:$0xf0]  ;;  %v420_v49 = vor.u32 %v510_v43, %v419_v42  ;;  %v392_v50 = vor.u32 %v501_v44, %v389_v45  ;;  %v395_v52 = vld [vmem:[%s776_s0 + $0x30] sm:$0xf]  ;;  %v504_v53 = vld [vmem:[%s776_s0 + $0x34] sm:$0xf0] }
   0xf   :  { %287 = vmatpush.bf16.msra.mxu1 %v525_v7  ;;  %587 = vmatpush.bf16.msra.mxu3 %v525_v7  ;;  %v424_v51 = vor.u32 %v509_v46, %v421_v47  ;;  %v427_v54 = vld [vmem:[%s776_s0 + $0x70] sm:$0xf]  ;;  %v512_v55 = vld [vmem:[%s776_s0 + $0x74] sm:$0xf0]  ;;  %v503_v56 = vld [vmem:[%s776_s0 + $0x34] sm:$0xf]  ;;  %v396_v60 = vor.u32 %v504_v53, %v395_v52 }
  0x10   :  { %v397_v57 = vld [vmem:[%s776_s0 + $0x38] sm:$0xf0]  ;;  %v511_v58 = vld [vmem:[%s776_s0 + $0x74] sm:$0xf]  ;;  %v428_v61 = vor.u32 %v512_v55, %v427_v54 }
  0x11   :  { %v429_v59 = vld [vmem:[%s776_s0 + $0x78] sm:$0xf0]  ;;  %v400_v62 = vor.u32 %v503_v56, %v397_v57 }
  0x12   :  { %239 = vmatpush.bf16.msra.mxu0 %v516_v8  ;;  %580 = vmatpush.bf16.msra.mxu2 %v516_v8  ;;  %v432_v63 = vor.u32 %v511_v58, %v429_v59 }
  0x13   :  { %288 = vmatpush.bf16.msra.mxu1 %v524_v9  ;;  %588 = vmatpush.bf16.msra.mxu3 %v524_v9 }
  0x16   :  { %240 = vmatpush.bf16.msra.mxu0 %v515_v10  ;;  %581 = vmatpush.bf16.msra.mxu2 %v515_v10 }
  0x17   :  { %289 = vmatpush.bf16.msra.mxu1 %v523_v11  ;;  %589 = vmatpush.bf16.msra.mxu3 %v523_v11 }
  0x1a   :  { %241 = vmatpush.bf16.msra.mxu0 %v514_v12  ;;  %582 = vmatpush.bf16.msra.mxu2 %v514_v12 }
  0x1b   :  { %290 = vmatpush.bf16.msra.mxu1 %v522_v13  ;;  %590 = vmatpush.bf16.msra.mxu3 %v522_v13 }
  0x1e   :  { %242 = vmatpush.bf16.msra.mxu0 %v513_v14  ;;  %583 = vmatpush.bf16.msra.mxu2 %v513_v14 }
  0x1f   :  { %291 = vmatpush.bf16.msra.mxu1 %v521_v15  ;;  %591 = vmatpush.bf16.msra.mxu3 %v521_v15 }
  0x21   :  { %243 = vmatmul.bf16.vlgmr.msra.gmra.mxu0 %v372_v24  ;;  %263 = vmatmul.bf16.vlgmr.msra.gmra.mxu2 %v404_v25 }
  0x22   :  { %292 = vmatmul.bf16.vlgmr.msra.gmra.mxu1 %v376_v26  ;;  %312 = vmatmul.bf16.vlgmr.msra.gmra.mxu3 %v408_v27 }
  0x31   :  { %248 = vmatmul.bf16.gmra.mxu0 %v380_v36  ;;  %268 = vmatmul.bf16.gmra.mxu2 %v412_v37 }
  0x32   :  { %297 = vmatmul.bf16.gmra.mxu1 %v384_v38  ;;  %317 = vmatmul.bf16.gmra.mxu3 %v416_v39 }
  0x41   :  { %253 = vmatmul.bf16.gmra.mxu0 %v388_v48  ;;  %273 = vmatmul.bf16.gmra.mxu2 %v420_v49 }
  0x42   :  { %302 = vmatmul.bf16.gmra.mxu1 %v392_v50  ;;  %322 = vmatmul.bf16.gmra.mxu3 %v424_v51 }
  0x51   :  { %258 = vmatmul.bf16.gmra.mxu0 %v396_v60  ;;  %278 = vmatmul.bf16.gmra.mxu2 %v428_v61 }
  0x52   :  { %307 = vmatmul.bf16.gmra.mxu1 %v400_v62  ;;  %327 = vmatmul.bf16.gmra.mxu3 %v432_v63 }
  0x9e   :  { %v244_v0 = vpop.f32.mrf.mxu0 }
  0x9f   :  { %v293_v1 = vpop.f32.mrf.mxu1 }
  0xa0   :  { %v294_v6 = vadd.f32 %v293_v1, %v244_v0 }
  0xa4   :  { %v264_v2 = vpop.f32.mrf.mxu2 }
  0xa5   :  { %v313_v3 = vpop.f32.mrf.mxu3 }
  0xa6   :  { %v246_v4 = vpop.f32.mrf.mxu0  ;;  %v314_v11 = vadd.f32 %v313_v3, %v264_v2 }
  0xa7   :  { %v295_v5 = vpop.f32.mrf.mxu1 }
  0xa8   :  { %v296_v7 = vadd.f32 %v295_v5, %v246_v4 }
  0xaa   :  { %v532_v8 = vpack.c.bf16 %v296_v7, %v294_v6 }
  0xac   :  { %533 = vst [vmem:[%s777_s2] sm:$0xff] %v532_v8   ;;  %v266_v9 = vpop.f32.mrf.mxu2 }
  0xad   :  { %v315_v10 = vpop.f32.mrf.mxu3 }
  0xae   :  { %v316_v12 = vadd.f32 %v315_v10, %v266_v9  ;;  %v249_v13 = vpop.f32.mrf.mxu0 }
  0xaf   :  { %v298_v14 = vpop.f32.mrf.mxu1 }
  0xb0   :  { %v552_v15 = vpack.c.bf16 %v316_v12, %v314_v11  ;;  %v299_v20 = vadd.f32 %v298_v14, %v249_v13 }
  0xb2   :  { %572 = vst [vmem:[%s777_s2 + $0x20] sm:$0xff] %v552_v15  }
  0xb4   :  { %v269_v16 = vpop.f32.mrf.mxu2 }
  0xb5   :  { %v318_v17 = vpop.f32.mrf.mxu3 }
  0xb6   :  { %v251_v18 = vpop.f32.mrf.mxu0  ;;  %v319_v25 = vadd.f32 %v318_v17, %v269_v16 }
  0xb7   :  { %v300_v19 = vpop.f32.mrf.mxu1 }
  0xb8   :  { %v301_v21 = vadd.f32 %v300_v19, %v251_v18 }
  0xba   :  { %v537_v22 = vpack.c.bf16 %v301_v21, %v299_v20 }
  0xbc   :  { %569 = vst [vmem:[%s777_s2 + $0x8] sm:$0xff] %v537_v22   ;;  %v271_v23 = vpop.f32.mrf.mxu2 }
  0xbd   :  { %v320_v24 = vpop.f32.mrf.mxu3 }
  0xbe   :  { %v321_v26 = vadd.f32 %v320_v24, %v271_v23  ;;  %v254_v27 = vpop.f32.mrf.mxu0 }
  0xbf   :  { %v303_v28 = vpop.f32.mrf.mxu1 }
  0xc0   :  { %v557_v29 = vpack.c.bf16 %v321_v26, %v319_v25  ;;  %v304_v34 = vadd.f32 %v303_v28, %v254_v27 }
  0xc2   :  { %573 = vst [vmem:[%s777_s2 + $0x28] sm:$0xff] %v557_v29  }
  0xc4   :  { %v274_v30 = vpop.f32.mrf.mxu2 }
  0xc5   :  { %v323_v31 = vpop.f32.mrf.mxu3 }
  0xc6   :  { %v256_v32 = vpop.f32.mrf.mxu0  ;;  %v324_v39 = vadd.f32 %v323_v31, %v274_v30 }
  0xc7   :  { %v305_v33 = vpop.f32.mrf.mxu1 }
  0xc8   :  { %v306_v35 = vadd.f32 %v305_v33, %v256_v32 }
  0xca   :  { %v542_v36 = vpack.c.bf16 %v306_v35, %v304_v34 }
  0xcc   :  { %570 = vst [vmem:[%s777_s2 + $0x10] sm:$0xff] %v542_v36   ;;  %v276_v37 = vpop.f32.mrf.mxu2 }
  0xcd   :  { %v325_v38 = vpop.f32.mrf.mxu3 }
  0xce   :  { %v326_v40 = vadd.f32 %v325_v38, %v276_v37  ;;  %v259_v41 = vpop.f32.mrf.mxu0 }
  0xcf   :  { %v308_v42 = vpop.f32.mrf.mxu1 }
  0xd0   :  { %v562_v43 = vpack.c.bf16 %v326_v40, %v324_v39  ;;  %v309_v48 = vadd.f32 %v308_v42, %v259_v41 }
  0xd2   :  { %574 = vst [vmem:[%s777_s2 + $0x30] sm:$0xff] %v562_v43  }
  0xd4   :  { %v279_v44 = vpop.f32.mrf.mxu2 }
  0xd5   :  { %v328_v45 = vpop.f32.mrf.mxu3 }
  0xd6   :  { %v261_v46 = vpop.f32.mrf.mxu0  ;;  %v329_v53 = vadd.f32 %v328_v45, %v279_v44 }
  0xd7   :  { %v310_v47 = vpop.f32.mrf.mxu1 }
  0xd8   :  { %v311_v49 = vadd.f32 %v310_v47, %v261_v46 }
  0xda   :  { %v547_v50 = vpack.c.bf16 %v311_v49, %v309_v48 }
  0xdc   :  { %571 = vst [vmem:[%s777_s2 + $0x18] sm:$0xff] %v547_v50   ;;  %v281_v51 = vpop.f32.mrf.mxu2 }
  0xdd   :  { %v330_v52 = vpop.f32.mrf.mxu3 }
  0xde   :  { %v331_v54 = vadd.f32 %v330_v52, %v281_v51 }
  0xe0   :  { %v567_v55 = vpack.c.bf16 %v331_v54, %v329_v53 }
  0xe2   :  { %575 = vst [vmem:[%s777_s2 + $0x38] sm:$0xff] %v567_v55  }

// kernel: gcn_forward.5
= control target key start
LH: loop header
LB: loop body
LE: loop exit
PB: predicated region body
PF: predicated region fallthrough
CT: control target
= control target key end

     0   :  { %s604_s1 = inlined_call_operand.vmem [shape: bf16[128,128], index: 1, kind: input, shape index: {}]   ;;  %s605_s2 = inlined_call_operand.vmem [shape: f32[1,128], index: 2, kind: input, shape index: {}]   ;;  %s606_s0 = inlined_call_operand.vmem [shape: bf16[128,128], index: 0, kind: input, shape index: {}]   ;;  %s607_s3 = inlined_call_operand.vmem [shape: bf16[128,128], index: 3, kind: output, shape index: {}]  }
   0x1   :  { %v428_v0 = vld [vmem:[%s604_s1 + $0x38] sm:$0xff]  ;;  %v427_v1 = vld [vmem:[%s604_s1 + $0x30] sm:$0xff]  ;;  %v426_v2 = vld [vmem:[%s604_s1 + $0x28] sm:$0xff] }
   0x2   :  { %183 = vmatpush.bf16.msra.mxu0 %v428_v0  ;;  %484 = vmatpush.bf16.msra.mxu1 %v428_v0  ;;  %v425_v3 = vld [vmem:[%s604_s1 + $0x20] sm:$0xff]  ;;  %v424_v4 = vld [vmem:[%s604_s1 + $0x18] sm:$0xff]  ;;  %v423_v5 = vld [vmem:[%s604_s1 + $0x10] sm:$0xff] }
   0x3   :  { %485 = vmatpush.bf16.msra.mxu2 %v428_v0  ;;  %486 = vmatpush.bf16.msra.mxu3 %v428_v0  ;;  %v422_v6 = vld [vmem:[%s604_s1 + $0x8] sm:$0xff]  ;;  %v421_v7 = vld [vmem:[%s604_s1] sm:$0xff]  ;;  %v431_v9 = vld [vmem:[%s606_s0 + $0x10] sm:$0xff] }
   0x4   :  { %v429_v8 = vld [vmem:[%s606_s0] sm:$0xff]  ;;  %v435_v11 = vld [vmem:[%s606_s0 + $0x30] sm:$0xff]  ;;  %v430_v12 = vld [vmem:[%s606_s0 + $0x8] sm:$0xff] }
   0x5   :  { %v433_v10 = vld [vmem:[%s606_s0 + $0x20] sm:$0xff]  ;;  %v432_v13 = vld [vmem:[%s606_s0 + $0x18] sm:$0xff]  ;;  %v434_v14 = vld [vmem:[%s606_s0 + $0x28] sm:$0xff] }
   0x6   :  { %184 = vmatpush.bf16.msra.mxu0 %v427_v1  ;;  %487 = vmatpush.bf16.msra.mxu1 %v427_v1  ;;  %v436_v15 = vld [vmem:[%s606_s0 + $0x38] sm:$0xff]  ;;  %v508_v18 = vld [vmem:[%s605_s2] ss:$0 sm:$0xff] }
   0x7   :  { %488 = vmatpush.bf16.msra.mxu2 %v427_v1  ;;  %489 = vmatpush.bf16.msra.mxu3 %v427_v1 }
   0xa   :  { %185 = vmatpush.bf16.msra.mxu0 %v426_v2  ;;  %490 = vmatpush.bf16.msra.mxu1 %v426_v2 }
   0xb   :  { %491 = vmatpush.bf16.msra.mxu2 %v426_v2  ;;  %492 = vmatpush.bf16.msra.mxu3 %v426_v2 }
   0xe   :  { %186 = vmatpush.bf16.msra.mxu0 %v425_v3  ;;  %493 = vmatpush.bf16.msra.mxu1 %v425_v3 }
   0xf   :  { %494 = vmatpush.bf16.msra.mxu2 %v425_v3  ;;  %495 = vmatpush.bf16.msra.mxu3 %v425_v3 }
  0x12   :  { %187 = vmatpush.bf16.msra.mxu0 %v424_v4  ;;  %496 = vmatpush.bf16.msra.mxu1 %v424_v4 }
  0x13   :  { %497 = vmatpush.bf16.msra.mxu2 %v424_v4  ;;  %498 = vmatpush.bf16.msra.mxu3 %v424_v4 }
  0x16   :  { %188 = vmatpush.bf16.msra.mxu0 %v423_v5  ;;  %499 = vmatpush.bf16.msra.mxu1 %v423_v5 }
  0x17   :  { %500 = vmatpush.bf16.msra.mxu2 %v423_v5  ;;  %501 = vmatpush.bf16.msra.mxu3 %v423_v5 }
  0x1a   :  { %189 = vmatpush.bf16.msra.mxu0 %v422_v6  ;;  %502 = vmatpush.bf16.msra.mxu1 %v422_v6 }
  0x1b   :  { %503 = vmatpush.bf16.msra.mxu2 %v422_v6  ;;  %504 = vmatpush.bf16.msra.mxu3 %v422_v6 }
  0x1e   :  { %190 = vmatpush.bf16.msra.mxu0 %v421_v7  ;;  %505 = vmatpush.bf16.msra.mxu1 %v421_v7 }
  0x1f   :  { %506 = vmatpush.bf16.msra.mxu2 %v421_v7  ;;  %507 = vmatpush.bf16.msra.mxu3 %v421_v7 }
  0x21   :  { %191 = vmatmul.bf16.vlgmr.msra.gmra.mxu0 %v429_v8  ;;  %201 = vmatmul.bf16.vlgmr.msra.gmra.mxu1 %v431_v9 }
  0x22   :  { %211 = vmatmul.bf16.vlgmr.msra.gmra.mxu2 %v433_v10  ;;  %221 = vmatmul.bf16.vlgmr.msra.gmra.mxu3 %v435_v11 }
  0x31   :  { %196 = vmatmul.bf16.gmra.mxu0 %v430_v12  ;;  %206 = vmatmul.bf16.gmra.mxu1 %v432_v13 }
  0x32   :  { %216 = vmatmul.bf16.gmra.mxu2 %v434_v14  ;;  %226 = vmatmul.bf16.gmra.mxu3 %v436_v15 }
  0x9e   :  { %v192_v16 = vpop.f32.mrf.mxu0  ;;  %v202_v17 = vpop.f32.mrf.mxu1 }
  0x9f   :  { %v287_v19 = vadd.f32 %v508_v18, %v192_v16  ;;  %v291_v20 = vadd.f32 %v508_v18, %v202_v17 }
  0xa1   :  { %v303_v27 = vmax.f32 %v287_v19, 0.0  ;;  %v307_v28 = vmax.f32 %v291_v20, 0.0 }
  0xa5   :  { %v212_v21 = vpop.f32.mrf.mxu2  ;;  %v222_v22 = vpop.f32.mrf.mxu3 }
  0xa6   :  { %v194_v23 = vpop.f32.mrf.mxu0  ;;  %v204_v24 = vpop.f32.mrf.mxu1  ;;  %v295_v33 = vadd.f32 %v508_v18, %v212_v21  ;;  %v299_v34 = vadd.f32 %v508_v18, %v222_v22 }
  0xa7   :  { %v288_v25 = vadd.f32 %v508_v18, %v194_v23  ;;  %v292_v26 = vadd.f32 %v508_v18, %v204_v24 }
  0xa8   :  { %v311_v41 = vmax.f32 %v295_v33, 0.0  ;;  %v315_v42 = vmax.f32 %v299_v34, 0.0 }
  0xa9   :  { %v304_v29 = vmax.f32 %v288_v25, 0.0  ;;  %v308_v30 = vmax.f32 %v292_v26, 0.0 }
  0xab   :  { %v440_v31 = vpack.c.bf16 %v304_v29, %v303_v27  ;;  %v450_v32 = vpack.c.bf16 %v308_v30, %v307_v28 }
  0xad   :  { %441 = vst [vmem:[%s607_s3] sm:$0xff] %v440_v31   ;;  %v214_v35 = vpop.f32.mrf.mxu2  ;;  %v224_v36 = vpop.f32.mrf.mxu3 }
  0xae   :  { %478 = vst [vmem:[%s607_s3 + $0x10] sm:$0xff] %v450_v32   ;;  %v296_v37 = vadd.f32 %v508_v18, %v214_v35  ;;  %v300_v38 = vadd.f32 %v508_v18, %v224_v36  ;;  %v197_v39 = vpop.f32.mrf.mxu0  ;;  %v207_v40 = vpop.f32.mrf.mxu1 }
  0xaf   :  { %v289_v47 = vadd.f32 %v508_v18, %v197_v39  ;;  %v293_v48 = vadd.f32 %v508_v18, %v207_v40 }
  0xb0   :  { %v312_v43 = vmax.f32 %v296_v37, 0.0  ;;  %v316_v44 = vmax.f32 %v300_v38, 0.0 }
  0xb1   :  { %v305_v55 = vmax.f32 %v289_v47, 0.0  ;;  %v309_v56 = vmax.f32 %v293_v48, 0.0 }
  0xb2   :  { %v460_v45 = vpack.c.bf16 %v312_v43, %v311_v41  ;;  %v470_v46 = vpack.c.bf16 %v316_v44, %v315_v42 }
  0xb4   :  { %480 = vst [vmem:[%s607_s3 + $0x20] sm:$0xff] %v460_v45  }
  0xb5   :  { %482 = vst [vmem:[%s607_s3 + $0x30] sm:$0xff] %v470_v46   ;;  %v217_v49 = vpop.f32.mrf.mxu2  ;;  %v227_v50 = vpop.f32.mrf.mxu3 }
  0xb6   :  { %v199_v51 = vpop.f32.mrf.mxu0  ;;  %v209_v52 = vpop.f32.mrf.mxu1  ;;  %v297_v61 = vadd.f32 %v508_v18, %v217_v49  ;;  %v301_v62 = vadd.f32 %v508_v18, %v227_v50 }
  0xb7   :  { %v290_v53 = vadd.f32 %v508_v18, %v199_v51  ;;  %v294_v54 = vadd.f32 %v508_v18, %v209_v52 }
  0xb8   :  { %v313_v3 = vmax.f32 %v297_v61, 0.0  ;;  %v317_v4 = vmax.f32 %v301_v62, 0.0 }
  0xb9   :  { %v306_v57 = vmax.f32 %v290_v53, 0.0  ;;  %v310_v58 = vmax.f32 %v294_v54, 0.0 }
  0xbb   :  { %v445_v59 = vpack.c.bf16 %v306_v57, %v305_v55  ;;  %v455_v60 = vpack.c.bf16 %v310_v58, %v309_v56 }
  0xbd   :  { %477 = vst [vmem:[%s607_s3 + $0x8] sm:$0xff] %v445_v59   ;;  %v219_v63 = vpop.f32.mrf.mxu2  ;;  %v229_v0 = vpop.f32.mrf.mxu3 }
  0xbe   :  { %479 = vst [vmem:[%s607_s3 + $0x18] sm:$0xff] %v455_v60   ;;  %v298_v1 = vadd.f32 %v508_v18, %v219_v63  ;;  %v302_v2 = vadd.f32 %v508_v18, %v229_v0 }
  0xc0   :  { %v314_v5 = vmax.f32 %v298_v1, 0.0  ;;  %v318_v6 = vmax.f32 %v302_v2, 0.0 }
  0xc2   :  { %v465_v7 = vpack.c.bf16 %v314_v5, %v313_v3  ;;  %v475_v8 = vpack.c.bf16 %v318_v6, %v317_v4 }
  0xc4   :  { %481 = vst [vmem:[%s607_s3 + $0x28] sm:$0xff] %v465_v7  }
  0xc5   :  { %483 = vst [vmem:[%s607_s3 + $0x38] sm:$0xff] %v475_v8  }

// kernel: gcn_forward.6
= control target key start
LH: loop header
LB: loop body
LE: loop exit
PB: predicated region body
PF: predicated region fallthrough
CT: control target
= control target key end

     0   :  { %s773_s1 = inlined_call_operand.vmem [shape: bf16[128,128], index: 1, kind: input, shape index: {}]   ;;  %s774_s0 = inlined_call_operand.vmem [shape: bf16[128,128], index: 0, kind: input, shape index: {}]   ;;  %s775_s2 = inlined_call_operand.vmem [shape: bf16[128,128], index: 2, kind: input, shape index: {}]   ;;  %s776_s3 = inlined_call_operand.vmem [shape: f32[1,128], index: 3, kind: input, shape index: {}]   ;;  %s777_s4 = inlined_call_operand.vmem [shape: bf16[128,128], index: 4, kind: output, shape index: {}]  }
   0x1   :  { %v568_v0 = vld [vmem:[%s773_s1 + $0x38] sm:$0xff]  ;;  %v567_v1 = vld [vmem:[%s773_s1 + $0x30] sm:$0xff]  ;;  %v566_v2 = vld [vmem:[%s773_s1 + $0x28] sm:$0xff] }
   0x2   :  { %186 = vmatpush.bf16.msra.mxu0 %v568_v0  ;;  %632 = vmatpush.bf16.msra.mxu2 %v568_v0  ;;  %v565_v3 = vld [vmem:[%s773_s1 + $0x20] sm:$0xff]  ;;  %v564_v4 = vld [vmem:[%s773_s1 + $0x18] sm:$0xff]  ;;  %v563_v5 = vld [vmem:[%s773_s1 + $0x10] sm:$0xff] }
   0x3   :  { %v562_v6 = vld [vmem:[%s773_s1 + $0x8] sm:$0xff]  ;;  %v561_v7 = vld [vmem:[%s773_s1] sm:$0xff]  ;;  %v584_v12 = vld [vmem:[%s775_s2 + $0x38] sm:$0xff] }
   0x4   :  { %v569_v8 = vld [vmem:[%s774_s0] sm:$0xff]  ;;  %v570_v10 = vld [vmem:[%s774_s0 + $0x8] sm:$0xff]  ;;  %362 = vmatpush.bf16.msra.mxu1 %v584_v12  ;;  %v583_v13 = vld [vmem:[%s775_s2 + $0x30] sm:$0xff]  ;;  %640 = vmatpush.bf16.msra.mxu3 %v584_v12 }
   0x5   :  { %v573_v9 = vld [vmem:[%s774_s0 + $0x20] sm:$0xff]  ;;  %v574_v11 = vld [vmem:[%s774_s0 + $0x28] sm:$0xff]  ;;  %v571_v16 = vld [vmem:[%s774_s0 + $0x10] sm:$0xff] }
   0x6   :  { %187 = vmatpush.bf16.msra.mxu0 %v567_v1  ;;  %633 = vmatpush.bf16.msra.mxu2 %v567_v1  ;;  %v582_v14 = vld [vmem:[%s775_s2 + $0x28] sm:$0xff]  ;;  %v581_v15 = vld [vmem:[%s775_s2 + $0x20] sm:$0xff]  ;;  %v575_v17 = vld [vmem:[%s774_s0 + $0x30] sm:$0xff] }
   0x7   :  { %v580_v18 = vld [vmem:[%s775_s2 + $0x18] sm:$0xff]  ;;  %v579_v21 = vld [vmem:[%s775_s2 + $0x10] sm:$0xff]  ;;  %v578_v22 = vld [vmem:[%s775_s2 + $0x8] sm:$0xff] }
   0x8   :  { %363 = vmatpush.bf16.msra.mxu1 %v583_v13  ;;  %641 = vmatpush.bf16.msra.mxu3 %v583_v13  ;;  %v572_v19 = vld [vmem:[%s774_s0 + $0x18] sm:$0xff]  ;;  %v577_v23 = vld [vmem:[%s775_s2] sm:$0xff] }
   0x9   :  { %v576_v20 = vld [vmem:[%s774_s0 + $0x38] sm:$0xff]  ;;  %v648_v49 = vld [vmem:[%s776_s3] ss:$0 sm:$0xff] }
   0xa   :  { %188 = vmatpush.bf16.msra.mxu0 %v566_v2  ;;  %634 = vmatpush.bf16.msra.mxu2 %v566_v2 }
   0xc   :  { %364 = vmatpush.bf16.msra.mxu1 %v582_v14  ;;  %642 = vmatpush.bf16.msra.mxu3 %v582_v14 }
   0xe   :  { %189 = vmatpush.bf16.msra.mxu0 %v565_v3  ;;  %635 = vmatpush.bf16.msra.mxu2 %v565_v3 }
  0x10   :  { %365 = vmatpush.bf16.msra.mxu1 %v581_v15  ;;  %643 = vmatpush.bf16.msra.mxu3 %v581_v15 }
  0x12   :  { %190 = vmatpush.bf16.msra.mxu0 %v564_v4  ;;  %636 = vmatpush.bf16.msra.mxu2 %v564_v4 }
  0x14   :  { %366 = vmatpush.bf16.msra.mxu1 %v580_v18  ;;  %644 = vmatpush.bf16.msra.mxu3 %v580_v18 }
  0x16   :  { %191 = vmatpush.bf16.msra.mxu0 %v563_v5  ;;  %637 = vmatpush.bf16.msra.mxu2 %v563_v5 }
  0x18   :  { %367 = vmatpush.bf16.msra.mxu1 %v579_v21  ;;  %645 = vmatpush.bf16.msra.mxu3 %v579_v21 }
  0x1a   :  { %192 = vmatpush.bf16.msra.mxu0 %v562_v6  ;;  %638 = vmatpush.bf16.msra.mxu2 %v562_v6 }
  0x1c   :  { %368 = vmatpush.bf16.msra.mxu1 %v578_v22  ;;  %646 = vmatpush.bf16.msra.mxu3 %v578_v22 }
  0x1e   :  { %193 = vmatpush.bf16.msra.mxu0 %v561_v7  ;;  %639 = vmatpush.bf16.msra.mxu2 %v561_v7 }
  0x20   :  { %369 = vmatpush.bf16.msra.mxu1 %v577_v23  ;;  %647 = vmatpush.bf16.msra.mxu3 %v577_v23 }
  0x21   :  { %194 = vmatmul.bf16.vlgmr.msra.gmra.mxu0 %v569_v8  ;;  %214 = vmatmul.bf16.vlgmr.msra.gmra.mxu2 %v573_v9 }
  0x31   :  { %199 = vmatmul.bf16.gmra.mxu0 %v570_v10  ;;  %219 = vmatmul.bf16.gmra.mxu2 %v574_v11 }
  0x41   :  { %204 = vmatmul.bf16.gmra.mxu0 %v571_v16  ;;  %224 = vmatmul.bf16.gmra.mxu2 %v575_v17 }
  0x51   :  { %209 = vmatmul.bf16.gmra.mxu0 %v572_v19  ;;  %229 = vmatmul.bf16.gmra.mxu2 %v576_v20 }
  0x9e   :  { %v195_v24 = vpop.f32.mrf.mxu0 }
  0xa4   :  { %v215_v25 = vpop.f32.mrf.mxu2 }
  0xa6   :  { %v197_v26 = vpop.f32.mrf.mxu0 }
  0xa7   :  { %v286_v27 = vpack.c.bf16 %v197_v26, %v195_v24 }
  0xa9   :  { %370 = vmatmul.bf16.vlgmr.msra.gmra.mxu1 %v286_v27 }
  0xac   :  { %v217_v28 = vpop.f32.mrf.mxu2 }
  0xad   :  { %v290_v29 = vpack.c.bf16 %v217_v28, %v215_v25 }
  0xae   :  { %v200_v30 = vpop.f32.mrf.mxu0 }
  0xaf   :  { %390 = vmatmul.bf16.vlgmr.msra.gmra.mxu3 %v290_v29 }
  0xb4   :  { %v220_v31 = vpop.f32.mrf.mxu2 }
  0xb6   :  { %v202_v32 = vpop.f32.mrf.mxu0 }
  0xb7   :  { %v287_v33 = vpack.c.bf16 %v202_v32, %v200_v30 }
  0xb9   :  { %375 = vmatmul.bf16.gmra.mxu1 %v287_v33 }
  0xbc   :  { %v222_v34 = vpop.f32.mrf.mxu2 }
  0xbd   :  { %v291_v35 = vpack.c.bf16 %v222_v34, %v220_v31 }
  0xbe   :  { %v205_v36 = vpop.f32.mrf.mxu0 }
  0xbf   :  { %395 = vmatmul.bf16.gmra.mxu3 %v291_v35 }
  0xc4   :  { %v225_v37 = vpop.f32.mrf.mxu2 }
  0xc6   :  { %v207_v38 = vpop.f32.mrf.mxu0 }
  0xc7   :  { %v288_v39 = vpack.c.bf16 %v207_v38, %v205_v36 }
  0xc9   :  { %380 = vmatmul.bf16.gmra.mxu1 %v288_v39 }
  0xcc   :  { %v227_v40 = vpop.f32.mrf.mxu2 }
  0xcd   :  { %v292_v41 = vpack.c.bf16 %v227_v40, %v225_v37 }
  0xce   :  { %v210_v42 = vpop.f32.mrf.mxu0 }
  0xcf   :  { %400 = vmatmul.bf16.gmra.mxu3 %v292_v41 }
  0xd4   :  { %v230_v43 = vpop.f32.mrf.mxu2 }
  0xd6   :  { %v212_v44 = vpop.f32.mrf.mxu0 }
  0xd7   :  { %v289_v45 = vpack.c.bf16 %v212_v44, %v210_v42 }
  0xd9   :  { %385 = vmatmul.bf16.gmra.mxu1 %v289_v45 }
  0xdc   :  { %v232_v46 = vpop.f32.mrf.mxu2 }
  0xdd   :  { %v293_v47 = vpack.c.bf16 %v232_v46, %v230_v43 }
  0xdf   :  { %405 = vmatmul.bf16.gmra.mxu3 %v293_v47 }
 0x126   :  { %v371_v48 = vpop.f32.mrf.mxu1 }
 0x127   :  { %v372_v50 = vadd.f32 %v648_v49, %v371_v48 }
 0x129   :  { %v411_v53 = vmax.f32 %v372_v50, 0.0 }
 0x12e   :  { %v373_v51 = vpop.f32.mrf.mxu1 }
 0x12f   :  { %v374_v52 = vadd.f32 %v648_v49, %v373_v51 }
 0x131   :  { %v412_v54 = vmax.f32 %v374_v52, 0.0 }
 0x132   :  { %v391_v55 = vpop.f32.mrf.mxu3 }
 0x133   :  { %v588_v56 = vpack.c.bf16 %v412_v54, %v411_v53  ;;  %v392_v58 = vadd.f32 %v648_v49, %v391_v55 }
 0x135   :  { %589 = vst [vmem:[%s777_s4] sm:$0xff] %v588_v56   ;;  %v419_v61 = vmax.f32 %v392_v58, 0.0 }
 0x136   :  { %v376_v57 = vpop.f32.mrf.mxu1 }
 0x137   :  { %v377_v62 = vadd.f32 %v648_v49, %v376_v57 }
 0x139   :  { %v413_v3 = vmax.f32 %v377_v62, 0.0 }
 0x13a   :  { %v393_v59 = vpop.f32.mrf.mxu3 }
 0x13b   :  { %v394_v60 = vadd.f32 %v648_v49, %v393_v59 }
 0x13d   :  { %v420_v63 = vmax.f32 %v394_v60, 0.0 }
 0x13e   :  { %v378_v0 = vpop.f32.mrf.mxu1 }
 0x13f   :  { %v608_v1 = vpack.c.bf16 %v420_v63, %v419_v61  ;;  %v379_v2 = vadd.f32 %v648_v49, %v378_v0 }
 0x141   :  { %628 = vst [vmem:[%s777_s4 + $0x20] sm:$0xff] %v608_v1   ;;  %v414_v4 = vmax.f32 %v379_v2, 0.0 }
 0x142   :  { %v396_v5 = vpop.f32.mrf.mxu3 }
 0x143   :  { %v593_v6 = vpack.c.bf16 %v414_v4, %v413_v3  ;;  %v397_v8 = vadd.f32 %v648_v49, %v396_v5 }
 0x145   :  { %625 = vst [vmem:[%s777_s4 + $0x8] sm:$0xff] %v593_v6   ;;  %v421_v11 = vmax.f32 %v397_v8, 0.0 }
 0x146   :  { %v381_v7 = vpop.f32.mrf.mxu1 }
 0x147   :  { %v382_v12 = vadd.f32 %v648_v49, %v381_v7 }
 0x149   :  { %v415_v17 = vmax.f32 %v382_v12, 0.0 }
 0x14a   :  { %v398_v9 = vpop.f32.mrf.mxu3 }
 0x14b   :  { %v399_v10 = vadd.f32 %v648_v49, %v398_v9 }
 0x14d   :  { %v422_v13 = vmax.f32 %v399_v10, 0.0 }
 0x14e   :  { %v383_v14 = vpop.f32.mrf.mxu1 }
 0x14f   :  { %v613_v15 = vpack.c.bf16 %v422_v13, %v421_v11  ;;  %v384_v16 = vadd.f32 %v648_v49, %v383_v14 }
 0x151   :  { %629 = vst [vmem:[%s777_s4 + $0x28] sm:$0xff] %v613_v15   ;;  %v416_v18 = vmax.f32 %v384_v16, 0.0 }
 0x152   :  { %v401_v19 = vpop.f32.mrf.mxu3 }
 0x153   :  { %v598_v20 = vpack.c.bf16 %v416_v18, %v415_v17  ;;  %v402_v22 = vadd.f32 %v648_v49, %v401_v19 }
 0x155   :  { %626 = vst [vmem:[%s777_s4 + $0x10] sm:$0xff] %v598_v20   ;;  %v423_v25 = vmax.f32 %v402_v22, 0.0 }
 0x156   :  { %v386_v21 = vpop.f32.mrf.mxu1 }
 0x157   :  { %v387_v26 = vadd.f32 %v648_v49, %v386_v21 }
 0x159   :  { %v417_v31 = vmax.f32 %v387_v26, 0.0 }
 0x15a   :  { %v403_v23 = vpop.f32.mrf.mxu3 }
 0x15b   :  { %v404_v24 = vadd.f32 %v648_v49, %v403_v23 }
 0x15d   :  { %v424_v27 = vmax.f32 %v404_v24, 0.0 }
 0x15e   :  { %v388_v28 = vpop.f32.mrf.mxu1 }
 0x15f   :  { %v618_v29 = vpack.c.bf16 %v424_v27, %v423_v25  ;;  %v389_v30 = vadd.f32 %v648_v49, %v388_v28 }
 0x161   :  { %630 = vst [vmem:[%s777_s4 + $0x30] sm:$0xff] %v618_v29   ;;  %v418_v32 = vmax.f32 %v389_v30, 0.0 }
 0x162   :  { %v406_v33 = vpop.f32.mrf.mxu3 }
 0x163   :  { %v603_v34 = vpack.c.bf16 %v418_v32, %v417_v31  ;;  %v407_v35 = vadd.f32 %v648_v49, %v406_v33 }
 0x165   :  { %627 = vst [vmem:[%s777_s4 + $0x18] sm:$0xff] %v603_v34   ;;  %v425_v38 = vmax.f32 %v407_v35, 0.0 }
 0x16a   :  { %v408_v36 = vpop.f32.mrf.mxu3 }
 0x16b   :  { %v409_v37 = vadd.f32 %v648_v49, %v408_v36 }
 0x16d   :  { %v426_v39 = vmax.f32 %v409_v37, 0.0 }
 0x16f   :  { %v623_v40 = vpack.c.bf16 %v426_v39, %v425_v38 }
 0x171   :  { %631 = vst [vmem:[%s777_s4 + $0x38] sm:$0xff] %v623_v40  }

// kernel: gcn_forward.7
= control target key start
LH: loop header
LB: loop body
LE: loop exit
PB: predicated region body
PF: predicated region fallthrough
CT: control target
= control target key end

     0   :  { %s718_s1 = inlined_call_operand.vmem [shape: bf16[128,128], index: 1, kind: input, shape index: {}]   ;;  %s719_s0 = inlined_call_operand.vmem [shape: bf16[128,128], index: 0, kind: input, shape index: {}]   ;;  %s720_s2 = inlined_call_operand.vmem [shape: bf16[128,128], index: 2, kind: input, shape index: {}]   ;;  %s721_s3 = inlined_call_operand.vmem [shape: f32[1,128], index: 3, kind: input, shape index: {}]   ;;  %s722_s4 = inlined_call_operand.vmem [shape: f32[128,128], index: 4, kind: output, shape index: {}]  }
   0x1   :  { %v536_v0 = vld [vmem:[%s718_s1 + $0x38] sm:$0xff]  ;;  %v535_v1 = vld [vmem:[%s718_s1 + $0x30] sm:$0xff]  ;;  %v534_v2 = vld [vmem:[%s718_s1 + $0x28] sm:$0xff] }
   0x2   :  { %186 = vmatpush.bf16.msra.mxu0 %v536_v0  ;;  %553 = vmatpush.bf16.msra.mxu2 %v536_v0  ;;  %v533_v3 = vld [vmem:[%s718_s1 + $0x20] sm:$0xff]  ;;  %v532_v4 = vld [vmem:[%s718_s1 + $0x18] sm:$0xff]  ;;  %v531_v5 = vld [vmem:[%s718_s1 + $0x10] sm:$0xff] }
   0x3   :  { %v530_v6 = vld [vmem:[%s718_s1 + $0x8] sm:$0xff]  ;;  %v529_v7 = vld [vmem:[%s718_s1] sm:$0xff]  ;;  %v552_v12 = vld [vmem:[%s720_s2 + $0x38] sm:$0xff] }
   0x4   :  { %v537_v8 = vld [vmem:[%s719_s0] sm:$0xff]  ;;  %v538_v10 = vld [vmem:[%s719_s0 + $0x8] sm:$0xff]  ;;  %362 = vmatpush.bf16.msra.mxu1 %v552_v12  ;;  %v551_v13 = vld [vmem:[%s720_s2 + $0x30] sm:$0xff]  ;;  %561 = vmatpush.bf16.msra.mxu3 %v552_v12 }
   0x5   :  { %v541_v9 = vld [vmem:[%s719_s0 + $0x20] sm:$0xff]  ;;  %v542_v11 = vld [vmem:[%s719_s0 + $0x28] sm:$0xff]  ;;  %v539_v16 = vld [vmem:[%s719_s0 + $0x10] sm:$0xff] }
   0x6   :  { %187 = vmatpush.bf16.msra.mxu0 %v535_v1  ;;  %554 = vmatpush.bf16.msra.mxu2 %v535_v1  ;;  %v550_v14 = vld [vmem:[%s720_s2 + $0x28] sm:$0xff]  ;;  %v549_v15 = vld [vmem:[%s720_s2 + $0x20] sm:$0xff]  ;;  %v543_v17 = vld [vmem:[%s719_s0 + $0x30] sm:$0xff] }
   0x7   :  { %v548_v18 = vld [vmem:[%s720_s2 + $0x18] sm:$0xff]  ;;  %v547_v21 = vld [vmem:[%s720_s2 + $0x10] sm:$0xff]  ;;  %v546_v22 = vld [vmem:[%s720_s2 + $0x8] sm:$0xff] }
   0x8   :  { %363 = vmatpush.bf16.msra.mxu1 %v551_v13  ;;  %562 = vmatpush.bf16.msra.mxu3 %v551_v13  ;;  %v540_v19 = vld [vmem:[%s719_s0 + $0x18] sm:$0xff]  ;;  %v545_v23 = vld [vmem:[%s720_s2] sm:$0xff] }
   0x9   :  { %v544_v20 = vld [vmem:[%s719_s0 + $0x38] sm:$0xff]  ;;  %v569_v48 = vld [vmem:[%s721_s3] ss:$0 sm:$0xff] }
   0xa   :  { %188 = vmatpush.bf16.msra.mxu0 %v534_v2  ;;  %555 = vmatpush.bf16.msra.mxu2 %v534_v2 }
   0xc   :  { %364 = vmatpush.bf16.msra.mxu1 %v550_v14  ;;  %563 = vmatpush.bf16.msra.mxu3 %v550_v14 }
   0xe   :  { %189 = vmatpush.bf16.msra.mxu0 %v533_v3  ;;  %556 = vmatpush.bf16.msra.mxu2 %v533_v3 }
  0x10   :  { %365 = vmatpush.bf16.msra.mxu1 %v549_v15  ;;  %564 = vmatpush.bf16.msra.mxu3 %v549_v15 }
  0x12   :  { %190 = vmatpush.bf16.msra.mxu0 %v532_v4  ;;  %557 = vmatpush.bf16.msra.mxu2 %v532_v4 }
  0x14   :  { %366 = vmatpush.bf16.msra.mxu1 %v548_v18  ;;  %565 = vmatpush.bf16.msra.mxu3 %v548_v18 }
  0x16   :  { %191 = vmatpush.bf16.msra.mxu0 %v531_v5  ;;  %558 = vmatpush.bf16.msra.mxu2 %v531_v5 }
  0x18   :  { %367 = vmatpush.bf16.msra.mxu1 %v547_v21  ;;  %566 = vmatpush.bf16.msra.mxu3 %v547_v21 }
  0x1a   :  { %192 = vmatpush.bf16.msra.mxu0 %v530_v6  ;;  %559 = vmatpush.bf16.msra.mxu2 %v530_v6 }
  0x1c   :  { %368 = vmatpush.bf16.msra.mxu1 %v546_v22  ;;  %567 = vmatpush.bf16.msra.mxu3 %v546_v22 }
  0x1e   :  { %193 = vmatpush.bf16.msra.mxu0 %v529_v7  ;;  %560 = vmatpush.bf16.msra.mxu2 %v529_v7 }
  0x20   :  { %369 = vmatpush.bf16.msra.mxu1 %v545_v23  ;;  %568 = vmatpush.bf16.msra.mxu3 %v545_v23 }
  0x21   :  { %194 = vmatmul.bf16.vlgmr.msra.gmra.mxu0 %v537_v8  ;;  %214 = vmatmul.bf16.vlgmr.msra.gmra.mxu2 %v541_v9 }
  0x31   :  { %199 = vmatmul.bf16.gmra.mxu0 %v538_v10  ;;  %219 = vmatmul.bf16.gmra.mxu2 %v542_v11 }
  0x41   :  { %204 = vmatmul.bf16.gmra.mxu0 %v539_v16  ;;  %224 = vmatmul.bf16.gmra.mxu2 %v543_v17 }
  0x51   :  { %209 = vmatmul.bf16.gmra.mxu0 %v540_v19  ;;  %229 = vmatmul.bf16.gmra.mxu2 %v544_v20 }
  0x9e   :  { %v195_v24 = vpop.f32.mrf.mxu0 }
  0xa4   :  { %v215_v25 = vpop.f32.mrf.mxu2 }
  0xa6   :  { %v197_v26 = vpop.f32.mrf.mxu0 }
  0xa7   :  { %v286_v27 = vpack.c.bf16 %v197_v26, %v195_v24 }
  0xa9   :  { %370 = vmatmul.bf16.vlgmr.msra.gmra.mxu1 %v286_v27 }
  0xac   :  { %v217_v28 = vpop.f32.mrf.mxu2 }
  0xad   :  { %v290_v29 = vpack.c.bf16 %v217_v28, %v215_v25 }
  0xae   :  { %v200_v30 = vpop.f32.mrf.mxu0 }
  0xaf   :  { %390 = vmatmul.bf16.vlgmr.msra.gmra.mxu3 %v290_v29 }
  0xb4   :  { %v220_v31 = vpop.f32.mrf.mxu2 }
  0xb6   :  { %v202_v32 = vpop.f32.mrf.mxu0 }
  0xb7   :  { %v287_v33 = vpack.c.bf16 %v202_v32, %v200_v30 }
  0xb9   :  { %375 = vmatmul.bf16.gmra.mxu1 %v287_v33 }
  0xbc   :  { %v222_v34 = vpop.f32.mrf.mxu2 }
  0xbd   :  { %v291_v35 = vpack.c.bf16 %v222_v34, %v220_v31 }
  0xbe   :  { %v205_v36 = vpop.f32.mrf.mxu0 }
  0xbf   :  { %395 = vmatmul.bf16.gmra.mxu3 %v291_v35 }
  0xc4   :  { %v225_v37 = vpop.f32.mrf.mxu2 }
  0xc6   :  { %v207_v38 = vpop.f32.mrf.mxu0 }
  0xc7   :  { %v288_v39 = vpack.c.bf16 %v207_v38, %v205_v36 }
  0xc9   :  { %380 = vmatmul.bf16.gmra.mxu1 %v288_v39 }
  0xcc   :  { %v227_v40 = vpop.f32.mrf.mxu2 }
  0xcd   :  { %v292_v41 = vpack.c.bf16 %v227_v40, %v225_v37 }
  0xce   :  { %v210_v42 = vpop.f32.mrf.mxu0 }
  0xcf   :  { %400 = vmatmul.bf16.gmra.mxu3 %v292_v41 }
  0xd4   :  { %v230_v43 = vpop.f32.mrf.mxu2 }
  0xd6   :  { %v212_v44 = vpop.f32.mrf.mxu0 }
  0xd7   :  { %v289_v45 = vpack.c.bf16 %v212_v44, %v210_v42 }
  0xd9   :  { %385 = vmatmul.bf16.gmra.mxu1 %v289_v45 }
  0xdc   :  { %v232_v46 = vpop.f32.mrf.mxu2 }
  0xdd   :  { %v293_v47 = vpack.c.bf16 %v232_v46, %v230_v43 }
  0xdf   :  { %405 = vmatmul.bf16.gmra.mxu3 %v293_v47 }
 0x126   :  { %v371_v49 = vpop.f32.mrf.mxu1 }
 0x127   :  { %v372_v50 = vadd.f32 %v569_v48, %v371_v49 }
 0x129   :  { %411 = vst [vmem:[%s722_s4] sm:$0xff] %v372_v50 }
 0x12e   :  { %v373_v51 = vpop.f32.mrf.mxu1 }
 0x12f   :  { %v374_v52 = vadd.f32 %v569_v48, %v373_v51 }
 0x131   :  { %412 = vst [vmem:[%s722_s4 + $0x8] sm:$0xff] %v374_v52 }
 0x132   :  { %v391_v53 = vpop.f32.mrf.mxu3 }
 0x133   :  { %v392_v54 = vadd.f32 %v569_v48, %v391_v53 }
 0x135   :  { %419 = vst [vmem:[%s722_s4 + $0x40] sm:$0xff] %v392_v54 }
 0x136   :  { %v376_v55 = vpop.f32.mrf.mxu1 }
 0x137   :  { %v377_v56 = vadd.f32 %v569_v48, %v376_v55 }
 0x139   :  { %413 = vst [vmem:[%s722_s4 + $0x10] sm:$0xff] %v377_v56 }
 0x13a   :  { %v393_v57 = vpop.f32.mrf.mxu3 }
 0x13b   :  { %v394_v58 = vadd.f32 %v569_v48, %v393_v57 }
 0x13d   :  { %420 = vst [vmem:[%s722_s4 + $0x48] sm:$0xff] %v394_v58 }
 0x13e   :  { %v378_v59 = vpop.f32.mrf.mxu1 }
 0x13f   :  { %v379_v60 = vadd.f32 %v569_v48, %v378_v59 }
 0x141   :  { %414 = vst [vmem:[%s722_s4 + $0x18] sm:$0xff] %v379_v60 }
 0x142   :  { %v396_v61 = vpop.f32.mrf.mxu3 }
 0x143   :  { %v397_v62 = vadd.f32 %v569_v48, %v396_v61 }
 0x145   :  { %421 = vst [vmem:[%s722_s4 + $0x50] sm:$0xff] %v397_v62 }
 0x146   :  { %v381_v63 = vpop.f32.mrf.mxu1 }
 0x147   :  { %v382_v0 = vadd.f32 %v569_v48, %v381_v63 }
 0x149   :  { %415 = vst [vmem:[%s722_s4 + $0x20] sm:$0xff] %v382_v0 }
 0x14a   :  { %v398_v1 = vpop.f32.mrf.mxu3 }
 0x14b   :  { %v399_v2 = vadd.f32 %v569_v48, %v398_v1 }
 0x14d   :  { %422 = vst [vmem:[%s722_s4 + $0x58] sm:$0xff] %v399_v2 }
 0x14e   :  { %v383_v3 = vpop.f32.mrf.mxu1 }
 0x14f   :  { %v384_v4 = vadd.f32 %v569_v48, %v383_v3 }
 0x151   :  { %416 = vst [vmem:[%s722_s4 + $0x28] sm:$0xff] %v384_v4 }
 0x152   :  { %v401_v5 = vpop.f32.mrf.mxu3 }
 0x153   :  { %v402_v6 = vadd.f32 %v569_v48, %v401_v5 }
 0x155   :  { %423 = vst [vmem:[%s722_s4 + $0x60] sm:$0xff] %v402_v6 }
 0x156   :  { %v386_v7 = vpop.f32.mrf.mxu1 }
 0x157   :  { %v387_v8 = vadd.f32 %v569_v48, %v386_v7 }
 0x159   :  { %417 = vst [vmem:[%s722_s4 + $0x30] sm:$0xff] %v387_v8 }
 0x15a   :  { %v403_v9 = vpop.f32.mrf.mxu3 }
 0x15b   :  { %v404_v10 = vadd.f32 %v569_v48, %v403_v9 }
 0x15d   :  { %424 = vst [vmem:[%s722_s4 + $0x68] sm:$0xff] %v404_v10 }
 0x15e   :  { %v388_v11 = vpop.f32.mrf.mxu1 }
 0x15f   :  { %v389_v12 = vadd.f32 %v569_v48, %v388_v11 }
 0x161   :  { %418 = vst [vmem:[%s722_s4 + $0x38] sm:$0xff] %v389_v12 }
 0x162   :  { %v406_v13 = vpop.f32.mrf.mxu3 }
 0x163   :  { %v407_v14 = vadd.f32 %v569_v48, %v406_v13 }
 0x165   :  { %425 = vst [vmem:[%s722_s4 + $0x70] sm:$0xff] %v407_v14 }
 0x16a   :  { %v408_v15 = vpop.f32.mrf.mxu3 }
 0x16b   :  { %v409_v16 = vadd.f32 %v569_v48, %v408_v15 }
 0x16d   :  { %426 = vst [vmem:[%s722_s4 + $0x78] sm:$0xff] %v409_v16 }

</bundles_post_ra>
